<compile_context>
chip_gen: v5e
topology: v5e:2x2
jax: 0.10.0
libtpu: 0.0.40
codegen_flags: <defaults>
</compile_context>

<pallas_src>
import functools

import jax
import jax.numpy as jnp
from jax.experimental import pallas as pl
from jax.experimental.pallas import tpu as pltpu


def _vmem_capacity_bytes() -> int:
    """Physical VMEM of the local TPU (128 MiB v5e/v6e, 64 MiB per-core v7x)."""
    try:
        cap = getattr(pltpu.get_tpu_info(), "vmem_capacity_bytes", None)
        if cap:
            return int(cap)
    except Exception:  # not queryable -> conservative (v7x per-core) default
        pass
    return 64 * 1024 * 1024


def _round_down(x: int, m: int) -> int:
    return max(m, (int(x) // m) * m)


def _focal_loss_kernel(logits_ref, targets_ref, loss_ref, *,
                       alpha, gamma, ignore_index, vocab_size):
    # logits_ref: (TM, V) input dtype; targets_ref: (TM, 1) int32; loss_ref: (TM, 1) f32
    logits = logits_ref[...].astype(jnp.float32)   # f32 math regardless of HBM dtype
    tgt = targets_ref[...]                         # (TM, 1) int32

    # numerically-stable log-sum-exp over the vocab (lane) axis
    m = jnp.max(logits, axis=-1, keepdims=True)
    s = jnp.sum(jnp.exp(logits - m), axis=-1, keepdims=True)
    lse = m + jnp.log(s)                           # (TM, 1)

    # gather the (clamped) target-class logit with a where-select
    lane_ids = jax.lax.broadcasted_iota(jnp.int32, logits.shape, 1)
    tgt_clamped = jnp.maximum(tgt, 0)
    logit_t = jnp.sum(jnp.where(lane_ids == tgt_clamped, logits, 0.0),
                      axis=-1, keepdims=True)      # (TM, 1)

    ce = lse - logit_t                             # cross entropy (reduction='none')
    pt = jnp.exp(logit_t - lse)                    # softmax prob of the target class
    one_minus_pt = jnp.maximum(1.0 - pt, 0.0)      # pt can exceed 1.0 by a ULP

    g = float(gamma)
    if g == int(g) and 0.0 <= g <= 8.0:
        # integer gamma (default 2.0): repeated multiply, no pow -> exp(log) on EUP
        focal_w = jnp.ones_like(one_minus_pt)
        for _ in range(int(g)):
            focal_w = focal_w * one_minus_pt
    else:
        focal_w = one_minus_pt ** g

    # Reference semantics: alpha_weight = sum_v(alpha*onehot + (1-alpha)*(1-onehot))
    #                                   = alpha + (1-alpha)*(V-1)  (constant per row)
    alpha_w = alpha + (1.0 - alpha) * (vocab_size - 1)

    valid = tgt != ignore_index
    loss_ref[...] = jnp.where(valid, focal_w * alpha_w * ce, 0.0)


def focal_loss(logits, targets, *, alpha=0.25, gamma=2.0, ignore_index=-100,
               reduction="mean", row_tile=None, interpret=False):
    """logits: [B, S, V] float (f32 or bf16), targets: [B, S] int. Focal loss."""
    B, S, V = logits.shape
    assert V % 128 == 0, "vocab_size must be a multiple of 128 (lane width)"
    N = B * S

    in_dtype = logits.dtype
    in_bytes = jnp.dtype(in_dtype).itemsize
    pack = max(8, 32 // in_bytes)          # min sublane tile: 8 f32, 16 bf16, 32 int8

    vmem_cap = _vmem_capacity_bytes()
    if row_tile is None:
        # VMEM budget per row: double-buffered input tile + ~3 f32 (TM, V) temporaries.
        per_row_bytes = V * (2 * in_bytes + 3 * 4)
        tile_budget = vmem_cap // 3
        row_tile = _round_down(tile_budget // max(per_row_bytes, 1), pack)
        row_tile = min(row_tile, 1024)     # diminishing returns past ~1K rows
    row_tile = _round_down(row_tile, pack)
    row_tile = min(row_tile, pl.cdiv(N, pack) * pack)   # don't overshoot tiny N

    # keep enough grid steps to shard across both v7x TensorCores / feed the pipeline
    min_tiles = 4
    if N > min_tiles * pack and pl.cdiv(N, row_tile) < min_tiles:
        row_tile = _round_down(pl.cdiv(N, min_tiles), pack)

    num_tiles = pl.cdiv(N, row_tile)
    n_padded = num_tiles * row_tile

    # TODO(synk): for very large vocabularies (V >~ 32K) add a second grid axis over V
    # with an online (flash-style) log-sum-exp so row_tile can stay large under v7x's
    # 64 MiB VMEM instead of collapsing to tiny row tiles.

    logits2d = logits.reshape(N, V)                      # keep HBM dtype (bf16 ok)
    targets1d = targets.reshape(N).astype(jnp.int32)
    if n_padded != N:
        logits2d = jnp.pad(logits2d, ((0, n_padded - N), (0, 0)))
        targets1d = jnp.pad(targets1d, (0, n_padded - N),
                            constant_values=ignore_index)
    targets2d = targets1d.reshape(n_padded, 1)

    kernel = functools.partial(
        _focal_loss_kernel,
        alpha=float(alpha), gamma=float(gamma),
        ignore_index=int(ignore_index), vocab_size=int(V),
    )

    # Raise the scoped VMEM limit (v5e default 16 MiB, v6e/v7x 32 MiB) but stay
    # well under the chip's physical capacity.
    vmem_limit = int(min(vmem_cap * 3 // 4, 96 * 1024 * 1024))

    per_pos = pl.pallas_call(
        kernel,
        out_shape=jax.ShapeDtypeStruct((n_padded, 1), jnp.float32),
        grid_spec=pltpu.PrefetchScalarGridSpec(
            num_scalar_prefetch=0,
            grid=(num_tiles,),
            in_specs=[
                pl.BlockSpec((row_tile, V), lambda i: (i, 0)),
                pl.BlockSpec((row_tile, 1), lambda i: (i, 0)),
            ],
            out_specs=pl.BlockSpec((row_tile, 1), lambda i: (i, 0)),
        ),
        compiler_params=pltpu.CompilerParams(
            dimension_semantics=("parallel",),
            vmem_limit_bytes=vmem_limit),
        interpret=interpret,
    )(logits2d, targets2d)

    loss = per_pos[:N, 0].reshape(B, S)
    if reduction == "none":
        return loss
    elif reduction == "sum":
        return loss.sum()
    elif reduction == "mean":
        mask = (targets != ignore_index).astype(jnp.float32)
        return loss.sum() / mask.sum()
    else:
        raise ValueError(f"Unknown reduction: {reduction}")


def _focal_loss_ref(logits, targets, *, alpha=0.25, gamma=2.0,
                    ignore_index=-100, reduction="mean"):
    """Pure-JAX reference mirroring the PyTorch module."""
    B, S, V = logits.shape
    logits = logits.astype(jnp.float32)
    ignore_mask = (targets != ignore_index).astype(jnp.float32)
    probs = jax.nn.softmax(logits, axis=-1)
    tgt = jnp.maximum(targets, 0)
    one_hot = jax.nn.one_hot(tgt, V, dtype=jnp.float32)
    pt = jnp.sum(probs * one_hot, axis=-1)
    focal_w = (1.0 - pt) ** gamma
    alpha_w = jnp.sum(alpha * one_hot + (1.0 - alpha) * (1.0 - one_hot), axis=-1)
    lse = jax.scipy.special.logsumexp(logits, axis=-1)
    ce = (lse - jnp.take_along_axis(logits, tgt[..., None], axis=-1)[..., 0])
    ce = ce * ignore_mask  # F.cross_entropy ignore_index zeroes these anyway
    loss = focal_w * alpha_w * ce * ignore_mask
    if reduction == "mean":
        return loss.sum() / ignore_mask.sum()
    elif reduction == "sum":
        return loss.sum()
    return loss


if __name__ == "__main__":
    key = jax.random.PRNGKey(0)
    B, S, V = 2, 8, 128  # small shapes: batch=2, seq=8, vocab=128

    k_logits, k_tgt = jax.random.split(key)
    logits = jax.random.normal(k_logits, (B, S, V), dtype=jnp.float32)
    targets = jax.random.randint(k_tgt, (B, S), 0, V, dtype=jnp.int32)
    # mark a couple of positions as ignored
    targets = targets.at[0, 3].set(-100).at[1, 5].set(-100)

    # f32 logits, all reductions
    for red in ("mean", "sum", "none"):
        out = jax.block_until_ready(
            focal_loss(logits, targets, alpha=0.25, gamma=2.0,
                       ignore_index=-100, reduction=red))
        ref = _focal_loss_ref(logits, targets, alpha=0.25, gamma=2.0,
                              ignore_index=-100, reduction=red)
        assert jnp.allclose(out, ref, rtol=1e-5, atol=1e-5), (red, out, ref)

    # bf16 logits stay bf16 in HBM (kernel upcasts per tile, row_tile multiple of 16)
    logits_bf16 = logits.astype(jnp.bfloat16)
    out_bf = jax.block_until_ready(
        focal_loss(logits_bf16, targets, alpha=0.25, gamma=2.0,
                   ignore_index=-100, reduction="mean"))
    ref_bf = _focal_loss_ref(logits_bf16.astype(jnp.float32), targets,
                             alpha=0.25, gamma=2.0, ignore_index=-100,
                             reduction="mean")
    assert jnp.allclose(out_bf, ref_bf, rtol=1e-4, atol=1e-4), (out_bf, ref_bf)

    # ragged N (B*S not a multiple of the tile) exercises the padding path
    B2, S2 = 3, 5
    k2a, k2b = jax.random.split(jax.random.PRNGKey(1))
    logits2 = jax.random.normal(k2a, (B2, S2, V), dtype=jnp.float32)
    targets2 = jax.random.randint(k2b, (B2, S2), 0, V, dtype=jnp.int32)
    targets2 = targets2.at[2, 4].set(-100)
    out2 = jax.block_until_ready(
        focal_loss(logits2, targets2, alpha=0.25, gamma=2.0,
                   ignore_index=-100, reduction="mean"))
    ref2 = _focal_loss_ref(logits2, targets2, alpha=0.25, gamma=2.0,
                           ignore_index=-100, reduction="mean")
    assert jnp.allclose(out2, ref2, rtol=1e-5, atol=1e-5), (out2, ref2)

    print("KERNEL_OK")
</pallas_src>

<mosaic_0001>
module attributes {stable_mosaic.version = 11 : i64} {
  func.func @_focal_loss_kernel(%arg0: i32, %arg1: memref<16x128xf32, #tpu.memory_space<vmem>>, %arg2: memref<16x1xi32, #tpu.memory_space<vmem>>, %arg3: memref<16x1xf32, #tpu.memory_space<vmem>>) attributes {dimension_semantics = [#tpu.dimension_semantics<parallel>], iteration_bounds = array<i64: 1>, scalar_prefetch = 0 : i64, scratch_operands = 0 : i64, tpu.core_type = #tpu.core_type<tc>, window_params = [{transform_indices = @transform_0, window_bounds = array<i64: 16, 128>}, {transform_indices = @transform_1, window_bounds = array<i64: 16, 1>}, {transform_indices = @transform_2, window_bounds = array<i64: 16, 1>}]} {
    %c0 = arith.constant 0 : index
    %c0_0 = arith.constant 0 : index
    %0 = vector.load %arg1[%c0, %c0_0] : memref<16x128xf32, #tpu.memory_space<vmem>>, vector<16x128xf32>
    %c0_1 = arith.constant 0 : index
    %c0_2 = arith.constant 0 : index
    %1 = vector.load %arg2[%c0_1, %c0_2] : memref<16x1xi32, #tpu.memory_space<vmem>>, vector<16x1xi32>
    %cst = arith.constant dense<0xFF800000> : vector<16xf32>
    %2 = vector.multi_reduction <maximumf>, %0, %cst [1] : vector<16x128xf32> to vector<16xf32>
    %3 = vector.shape_cast %2 : vector<16xf32> to vector<16x1xf32>
    %4 = vector.broadcast %3 : vector<16x1xf32> to vector<16x128xf32>
    %5 = arith.subf %0, %4 : vector<16x128xf32>
    %6 = math.exp %5 : vector<16x128xf32>
    %cst_3 = arith.constant dense<0.000000e+00> : vector<16xf32>
    %7 = vector.multi_reduction <add>, %6, %cst_3 [1] : vector<16x128xf32> to vector<16xf32>
    %8 = vector.shape_cast %7 : vector<16xf32> to vector<16x1xf32>
    %9 = math.log %8 : vector<16x1xf32>
    %10 = arith.addf %3, %9 : vector<16x1xf32>
    %11 = tpu.iota {dimensions = array<i32: 1>} : vector<16x128xi32>
    %c0_i32 = arith.constant 0 : i32
    %12 = vector.broadcast %c0_i32 : i32 to vector<16x1xi32>
    %13 = arith.maxsi %1, %12 : vector<16x1xi32>
    %14 = vector.broadcast %13 : vector<16x1xi32> to vector<16x128xi32>
    %15 = arith.cmpi eq, %11, %14 : vector<16x128xi32>
    %cst_4 = arith.constant 0.000000e+00 : f32
    %16 = vector.broadcast %cst_4 : f32 to vector<16x128xf32>
    %17 = arith.select %15, %0, %16 : vector<16x128xi1>, vector<16x128xf32>
    %cst_5 = arith.constant dense<0.000000e+00> : vector<16xf32>
    %18 = vector.multi_reduction <add>, %17, %cst_5 [1] : vector<16x128xf32> to vector<16xf32>
    %19 = vector.shape_cast %18 : vector<16xf32> to vector<16x1xf32>
    %20 = arith.subf %10, %19 : vector<16x1xf32>
    %21 = arith.subf %19, %10 : vector<16x1xf32>
    %22 = math.exp %21 : vector<16x1xf32>
    %cst_6 = arith.constant 1.000000e+00 : f32
    %23 = vector.broadcast %cst_6 : f32 to vector<16x1xf32>
    %24 = arith.subf %23, %22 : vector<16x1xf32>
    %cst_7 = arith.constant 0.000000e+00 : f32
    %25 = vector.broadcast %cst_7 : f32 to vector<16x1xf32>
    %26 = arith.maximumf %24, %25 : vector<16x1xf32>
    %cst_8 = arith.constant 1.000000e+00 : f32
    %27 = vector.broadcast %cst_8 : f32 to vector<16x1xf32>
    %28 = arith.mulf %27, %26 : vector<16x1xf32>
    %29 = arith.mulf %28, %26 : vector<16x1xf32>
    %c-100_i32 = arith.constant -100 : i32
    %30 = vector.broadcast %c-100_i32 : i32 to vector<16x1xi32>
    %31 = arith.cmpi ne, %1, %30 : vector<16x1xi32>
    %cst_9 = arith.constant 9.550000e+01 : f32
    %32 = vector.broadcast %cst_9 : f32 to vector<16x1xf32>
    %33 = arith.mulf %29, %32 : vector<16x1xf32>
    %34 = arith.mulf %33, %20 : vector<16x1xf32>
    %cst_10 = arith.constant 0.000000e+00 : f32
    %35 = vector.broadcast %cst_10 : f32 to vector<16x1xf32>
    %36 = arith.select %31, %34, %35 : vector<16x1xi1>, vector<16x1xf32>
    %c0_11 = arith.constant 0 : index
    %c0_12 = arith.constant 0 : index
    %37 = vector.load %arg3[%c0_11, %c0_12] : memref<16x1xf32, #tpu.memory_space<vmem>>, vector<16x1xf32>
    tpu.vector_store %arg3[%c0_11, %c0_12], %36 {strides = array<i32>} : memref<16x1xf32, #tpu.memory_space<vmem>>, vector<16x1xf32>,
    return
  }
  func.func @transform_0(%arg0: i32) -> (i32, i32) {
    %c0_i32 = arith.constant 0 : i32
    %c0_i32_0 = arith.constant 0 : i32
    return %arg0, %c0_i32 : i32, i32
  }
  func.func @transform_1(%arg0: i32) -> (i32, i32) {
    %c0_i32 = arith.constant 0 : i32
    %c0_i32_0 = arith.constant 0 : i32
    return %arg0, %c0_i32 : i32, i32
  }
  func.func @transform_2(%arg0: i32) -> (i32, i32) {
    %c0_i32 = arith.constant 0 : i32
    %c0_i32_0 = arith.constant 0 : i32
    return %arg0, %c0_i32 : i32, i32
  }
}

</mosaic_0001>

<bundles_post_ra>
// kernel: tpu_custom_call.1
= control target key start
LH: loop header
LB: loop body
LE: loop exit
PB: predicated region body
PF: predicated region fallthrough
CT: control target
= control target key end

     0   :  { %v99_v1 = vmov 0   ;;  %v35_v7 = vlaneseq  ;;  %vm77_vm5 = vcmask 7168   ;;  %s143_s0 = inlined_call_operand.vmem [shape: f32[16,128], index: 0, kind: input, shape index: {}]   ;;  %s144_s1 = inlined_call_operand.vmem [shape: s32[16,1], index: 1, kind: input, shape index: {}]   ;;  %s145_s2 = inlined_call_operand.vmem [shape: f32[16,1], index: 2, kind: output, shape index: {}]  }
   0x1   :  { %v11_v0 = vld [vmem:[%s143_s0] sm:$0xff]  ;;  %85 = vset.pattern.permute.xlu1 %v99_v1  ;;  %86 = vset.pattern.permute.xlu0 %v99_v1  ;;  %v128_v4 = vld [vmem:[%s144_s1 + $0x8] sm:$0xff] }
   0x2   :  { %v121_v2 = vld [vmem:[%s144_s1] sm:$0xff]  ;;  %15 = vmax.xlane.f32.xlu0 %v11_v0  ;;  %vm39_vm1 = vcmp.gt.s32.totalorder %v128_v4, 0  ;;  %v12_v5 = vld [vmem:[%s143_s0 + $0x8] sm:$0xff]  ;;  %v36_v8 = vand.u32 127, %v35_v7  ;;  %vm70_vm6 = vcmp.ne.s32.totalorder %v128_v4, 4294967196 }
   0x3   :  { %vm37_vm0 = vcmp.gt.s32.totalorder %v121_v2, 0  ;;  %v40_v6 = vsel %vm39_vm1, %v128_v4, 0  ;;  %vm69_vm4 = vcmp.ne.s32.totalorder %v121_v2, 4294967196 }
   0x4   :  { %v38_v3 = vsel %vm37_vm0, %v121_v2, 0 }
   0x5   :  { %42 = vperm.xlu1 %85, %v38_v3  }
   0xa   :  { %17 = vmax.xlane.f32.xlu0 %v12_v5 }
   0xd   :  { %45 = vperm.xlu1 %85, %v40_v6  }
  0x75   :  { %v16_v9 = vpop.xlane.xlu0 %15 }
  0x76   :  { %v19_v10 = vsub.f32 %v11_v0, %v16_v9 }
  0x77   :  { %v43_v11 = vpop.permute.xlu1 %42 }
  0x78   :  { %vm47_vm2 = vcmp.eq.s32.totalorder %v36_v8, %v43_v11  ;;  %v21_v12 = vmul.f32 1.442695, %v19_v10 }
  0x79   :  { %v49_v13 = vsel %vm47_vm2, %v11_v0, 0.0 }
  0x7a   :  { %51 = vadd.xlane.f32.xlu0 %v49_v13  ;;  %87 = vpow2.f32 %v21_v12 }
  0x7d   :  { %v18_v14 = vpop.xlane.xlu0 %17 }
  0x7e   :  { %v20_v15 = vsub.f32 %v12_v5, %v18_v14 }
  0x7f   :  { %v46_v16 = vpop.permute.xlu1 %45 }
  0x80   :  { %vm48_vm3 = vcmp.eq.s32.totalorder %v36_v8, %v46_v16  ;;  %v88_v17 = vpop.eup %87  ;;  %v23_v18 = vmul.f32 1.442695, %v20_v15 }
  0x81   :  { %v50_v19 = vsel %vm48_vm3, %v12_v5, 0.0  ;;  %25 = vadd.xlane.f32.xlu2 %v88_v17 }
  0x82   :  { %53 = vadd.xlane.f32.xlu1 %v50_v19  ;;  %89 = vpow2.f32 %v23_v18 }
  0x88   :  { %v90_v20 = vpop.eup %89 }
  0x89   :  { %27 = vadd.xlane.f32.xlu2 %v90_v20 }
  0xed   :  { %v52_v25 = vpop.xlane.xlu0 %51 }
  0xf4   :  { %v26_v21 = vpop.xlane.xlu2 %25 }
  0xf5   :  { %91 = vlog2.f32 %v26_v21  ;;  %v54_v32 = vpop.xlane.xlu1 %53 }
  0xfb   :  { %v92_v22 = vpop.eup %91 }
  0xfc   :  { %v30_v23 = vmul.f32 0.6931472, %v92_v22  ;;  %v28_v24 = vpop.xlane.xlu2 %27 }
  0xfd   :  { %93 = vlog2.f32 %v28_v24 }
  0xfe   :  { %v33_v26 = vadd.f32 %v30_v23, %v16_v9 }
 0x100   :  { %v57_v27 = vsub.f32 %v52_v25, %v33_v26  ;;  %v55_v39 = vsub.f32 %v33_v26, %v52_v25 }
 0x102   :  { %v59_v28 = vmul.f32 1.442695, %v57_v27 }
 0x103   :  { %v94_v29 = vpop.eup %93 }
 0x104   :  { %v32_v30 = vmul.f32 0.6931472, %v94_v29  ;;  %95 = vpow2.f32 %v59_v28 }
 0x106   :  { %v34_v31 = vadd.f32 %v32_v30, %v18_v14 }
 0x108   :  { %v58_v33 = vsub.f32 %v54_v32, %v34_v31  ;;  %v56_v47 = vsub.f32 %v34_v31, %v54_v32 }
 0x10a   :  { %v96_v34 = vpop.eup %95  ;;  %v61_v35 = vmul.f32 1.442695, %v58_v33 }
 0x10b   :  { %v63_v36 = vsub.f32 1.0, %v96_v34 }
 0x10c   :  { %97 = vpow2.f32 %v61_v35 }
 0x10d   :  { %v65_v37 = vmax.f32 %v63_v36, 0.0 }
 0x10f   :  { %v67_v38 = vmul.f32 %v65_v37, %v65_v37 }
 0x111   :  { %v71_v40 = vmul.f32 95.5, %v67_v38 }
 0x112   :  { %v98_v41 = vpop.eup %97 }
 0x113   :  { %v64_v42 = vsub.f32 1.0, %v98_v41  ;;  %v73_v43 = vmul.f32 %v71_v40, %v55_v39 }
 0x115   :  { %v66_v44 = vmax.f32 %v64_v42, 0.0  ;;  %v75_v45 = vsel %vm69_vm4, %v73_v43, 0.0 }
 0x116   :  { %78 = vst.msk [vmem:[%s145_s2] sm:$0xff] %vm77_vm5, %v75_v45 }
 0x117   :  { %v68_v46 = vmul.f32 %v66_v44, %v66_v44 }
 0x119   :  { %v72_v48 = vmul.f32 95.5, %v68_v46 }
 0x11b   :  { %v74_v49 = vmul.f32 %v72_v48, %v56_v47 }
 0x11d   :  { %v76_v50 = vsel %vm70_vm6, %v74_v49, 0.0 }
 0x11e   :  { %79 = vst.msk [vmem:[%s145_s2 + $0x8] sm:$0xff] %vm77_vm5, %v76_v50 }

</bundles_post_ra>
